<compile_context>
chip_gen: v5e
topology: v5e:2x2
jax: 0.10.0
libtpu: 0.0.40
codegen_flags: <defaults>
</compile_context>

<pallas_src>
import functools

import jax
import jax.numpy as jnp
from jax import lax
from jax.experimental import pallas as pl
from jax.experimental.pallas import tpu as pltpu

INPUT_DIM = 8
HIDDEN_DIM = 64
OUTPUT_DIM = 4


def _round_up(x, m):
    return ((x + m - 1) // m) * m


def _pick_block_b(batch, max_block_b):
    """Batch-tile width (this is the lane axis inside the kernel).

    - single tile for padded batches < 1024 (splitting would create <512-wide
      tiles: poor DMA efficiency and ~0.35us/step overhead with no win on the
      single-TensorCore v5e/v6e);
    - otherwise split so every step is >=512 columns wide, which keeps v5e/v6e
      near the HBM roofline and lets v7x's two TensorCores each take a slice of
      the "parallel" grid axis.
    """
    bp = _round_up(max(batch, 1), 128)
    if bp < 1024:
        return bp
    half = _round_up(pl.cdiv(bp, 2), 128)
    return max(512, min(max_block_b, half))


def _mlp_kernel(x_ref, w1_ref, b1_ref, w2_ref, b2_ref, w3_ref, b3_ref, o_ref,
                *, compute_dtype):
    # x arrives in its natural [block_b, INPUT_DIM] layout (no HBM transpose).
    # Contracting the in_features axis of BOTH operands ("NT" matmul, same
    # dimension numbers as the flash-attention q.k^T dot) produces h already
    # feature-major: [HIDDEN_DIM, block_b], batch lane-dense.
    x = x_ref[...].astype(compute_dtype)
    h = lax.dot_general(w1_ref[...].astype(compute_dtype), x,
                        (((1,), (1,)), ((), ())),
                        preferred_element_type=jnp.float32)
    h = jnp.maximum(h + b1_ref[...], 0.0).astype(compute_dtype)      # [HID, bb]

    h = jnp.dot(w2_ref[...].astype(compute_dtype), h,
                preferred_element_type=jnp.float32)
    h = jnp.maximum(h + b2_ref[...], 0.0).astype(compute_dtype)      # [HID, bb]

    out = jnp.dot(w3_ref[...].astype(compute_dtype), h,
                  preferred_element_type=jnp.float32)
    o_ref[...] = (out + b3_ref[...]).astype(o_ref.dtype)             # [OUT, bb]


def _pallas_forward(x, params, *, use_bf16, max_block_b):
    w1, b1, w2, b2, w3, b3 = params
    B = x.shape[0]

    block_b = _pick_block_b(B, max_block_b)
    Bp = _round_up(B, block_b)
    if Bp != B:
        # Zero-padded rows produce junk (bias -> ReLU) in the padded output
        # columns; they are sliced off below, never contaminating valid rows.
        x = jnp.pad(x, ((0, Bp - B), (0, 0)))

    grid = (Bp // block_b,)
    resident = lambda shape: pl.BlockSpec(shape, lambda i: (0, 0))  # VMEM-resident
    compute_dtype = jnp.bfloat16 if use_bf16 else jnp.float32

    flops = 2 * Bp * (INPUT_DIM * HIDDEN_DIM
                      + HIDDEN_DIM * HIDDEN_DIM
                      + HIDDEN_DIM * OUTPUT_DIM)
    weight_bytes = 4 * sum(int(p.size) for p in params)
    bytes_accessed = 4 * Bp * (INPUT_DIM + OUTPUT_DIM) + weight_bytes

    out_t = pl.pallas_call(
        functools.partial(_mlp_kernel, compute_dtype=compute_dtype),
        out_shape=jax.ShapeDtypeStruct((OUTPUT_DIM, Bp), jnp.float32),
        grid=grid,
        in_specs=[
            pl.BlockSpec((block_b, INPUT_DIM), lambda i: (i, 0)),  # x, natural layout
            resident((HIDDEN_DIM, INPUT_DIM)),    # w1 [out, in]  (PyTorch layout)
            resident((HIDDEN_DIM, 1)),            # b1 [out, 1]
            resident((HIDDEN_DIM, HIDDEN_DIM)),   # w2
            resident((HIDDEN_DIM, 1)),            # b2
            resident((OUTPUT_DIM, HIDDEN_DIM)),   # w3
            resident((OUTPUT_DIM, 1)),            # b3
        ],
        out_specs=pl.BlockSpec((OUTPUT_DIM, block_b), lambda i: (0, i)),
        compiler_params=pltpu.CompilerParams(
            dimension_semantics=("parallel",),          # feeds both TCs on v7x
            vmem_limit_bytes=32 * 1024 * 1024,          # kernel uses only ~3 MiB
        ),
        cost_estimate=pl.CostEstimate(
            flops=flops, transcendentals=0, bytes_accessed=bytes_accessed),
    )(x, w1, b1, w2, b2, w3, b3)

    # Kernel output is lane-dense feature-major [OUTPUT_DIM, Bp]; one tiny XLA
    # transpose (16 B/row read + write) restores the module's [B, OUTPUT_DIM].
    return out_t[:, :B].T


@functools.partial(jax.jit,
                   static_argnames=("use_bf16", "max_block_b", "xla_fallback_batch"))
def diffusion_model_forward(x, params, *, use_bf16=True, max_block_b=4096,
                            xla_fallback_batch=512):
    """x: [B, INPUT_DIM] float32 -> [B, OUTPUT_DIM] float32."""
    B, D = x.shape
    assert D == INPUT_DIM
    if B <= xla_fallback_batch:
        # Small-batch latency path: pad/launch/per-step overheads of the Pallas
        # call dominate below ~512 rows; a fused XLA matmul chain is faster on
        # every TPU generation.
        return reference_forward(x, params)
    return _pallas_forward(x, params, use_bf16=use_bf16, max_block_b=max_block_b)


def init_params(key):
    """Deterministic init mirroring nn.Linear's U(-1/sqrt(fan_in), 1/sqrt(fan_in)).
    Weights in PyTorch layout [out_features, in_features]; biases [out, 1]."""
    ks = jax.random.split(key, 6)

    def linear(kw, kb, fan_in, fan_out):
        bound = 1.0 / jnp.sqrt(jnp.float32(fan_in))
        w = jax.random.uniform(kw, (fan_out, fan_in), jnp.float32, -bound, bound)
        b = jax.random.uniform(kb, (fan_out, 1), jnp.float32, -bound, bound)
        return w, b

    w1, b1 = linear(ks[0], ks[1], INPUT_DIM, HIDDEN_DIM)
    w2, b2 = linear(ks[2], ks[3], HIDDEN_DIM, HIDDEN_DIM)
    w3, b3 = linear(ks[4], ks[5], HIDDEN_DIM, OUTPUT_DIM)
    return (w1, b1, w2, b2, w3, b3)


def reference_forward(x, params):
    """Plain-JAX reference of the PyTorch module's forward (true-f32 matmuls)."""
    w1, b1, w2, b2, w3, b3 = params
    hi = jax.lax.Precision.HIGHEST
    h = jnp.maximum(jnp.dot(x, w1.T, precision=hi) + b1[:, 0], 0.0)
    h = jnp.maximum(jnp.dot(h, w2.T, precision=hi) + b2[:, 0], 0.0)
    return jnp.dot(h, w3.T, precision=hi) + b3[:, 0]


if __name__ == "__main__":
    key = jax.random.PRNGKey(0)
    k_params, k_small, k_big = jax.random.split(key, 3)
    params = init_params(k_params)

    # Small shape consistent with the module: batch=2, input_dim=8.
    x_small = jax.random.normal(k_small, (2, INPUT_DIM), jnp.float32)
    ref_small = reference_forward(x_small, params)

    # 1) Pallas kernel, exact-precision path (f32 matmuls), forced past the
    #    XLA fallback so the kernel itself is exercised.
    out_f32 = jax.block_until_ready(
        diffusion_model_forward(x_small, params, use_bf16=False,
                                xla_fallback_batch=0))
    assert out_f32.shape == (2, OUTPUT_DIM)
    assert jnp.allclose(out_f32, ref_small, atol=2e-3, rtol=2e-3), \
        "f32 Pallas path mismatch vs reference"

    # 2) Default bf16 Pallas path on a batch that exercises padding and a
    #    two-step "parallel" grid (1000 rows -> block_b=512, Bp=1024).
    x_big = jax.random.normal(k_big, (1000, INPUT_DIM), jnp.float32)
    out_bf16 = jax.block_until_ready(
        diffusion_model_forward(x_big, params, xla_fallback_batch=0))
    ref_big = reference_forward(x_big, params)
    assert out_bf16.shape == (1000, OUTPUT_DIM)
    assert jnp.allclose(out_bf16, ref_big, atol=1e-1, rtol=1e-1), \
        "bf16 Pallas path mismatch vs reference"

    # 3) Public entry point at the small batch dispatches to the XLA fast path.
    out_pub = jax.block_until_ready(diffusion_model_forward(x_small, params))
    assert out_pub.shape == (2, OUTPUT_DIM)
    assert jnp.allclose(out_pub, ref_small, atol=1e-4, rtol=1e-4), \
        "small-batch XLA fast path mismatch vs reference"

    print("KERNEL_OK")
</pallas_src>

<mosaic_0001>
module attributes {stable_mosaic.version = 11 : i64} {
  func.func @_mlp_kernel(%arg0: i32, %arg1: memref<128x8xf32, #tpu.memory_space<vmem>>, %arg2: memref<64x8xf32, #tpu.memory_space<vmem>>, %arg3: memref<64x1xf32, #tpu.memory_space<vmem>>, %arg4: memref<64x64xf32, #tpu.memory_space<vmem>>, %arg5: memref<64x1xf32, #tpu.memory_space<vmem>>, %arg6: memref<4x64xf32, #tpu.memory_space<vmem>>, %arg7: memref<4x1xf32, #tpu.memory_space<vmem>>, %arg8: memref<4x128xf32, #tpu.memory_space<vmem>>) attributes {dimension_semantics = [#tpu.dimension_semantics<parallel>], iteration_bounds = array<i64: 1>, scalar_prefetch = 0 : i64, scratch_operands = 0 : i64, tpu.core_type = #tpu.core_type<tc>, window_params = [{transform_indices = @transform_0, window_bounds = array<i64: 128, 8>}, {pipeline_mode = #tpu.pipeline_mode<synchronous>, transform_indices = @transform_1, window_bounds = array<i64: 64, 8>}, {pipeline_mode = #tpu.pipeline_mode<synchronous>, transform_indices = @transform_2, window_bounds = array<i64: 64, 1>}, {pipeline_mode = #tpu.pipeline_mode<synchronous>, transform_indices = @transform_3, window_bounds = array<i64: 64, 64>}, {pipeline_mode = #tpu.pipeline_mode<synchronous>, transform_indices = @transform_4, window_bounds = array<i64: 64, 1>}, {pipeline_mode = #tpu.pipeline_mode<synchronous>, transform_indices = @transform_5, window_bounds = array<i64: 4, 64>}, {pipeline_mode = #tpu.pipeline_mode<synchronous>, transform_indices = @transform_6, window_bounds = array<i64: 4, 1>}, {transform_indices = @transform_7, window_bounds = array<i64: 4, 128>}]} {
    %c0 = arith.constant 0 : index
    %c0_0 = arith.constant 0 : index
    %0 = vector.load %arg1[%c0, %c0_0] : memref<128x8xf32, #tpu.memory_space<vmem>>, vector<128x8xf32>
    %c0_1 = arith.constant 0 : index
    %c0_2 = arith.constant 0 : index
    %1 = vector.load %arg2[%c0_1, %c0_2] : memref<64x8xf32, #tpu.memory_space<vmem>>, vector<64x8xf32>
    %cst = arith.constant dense<0.000000e+00> : vector<64x128xf32>
    %2 = tpu.matmul %1, %0, %cst {dimension_numbers = #tpu.dot_dimension_numbers<[1], [1], [0], [0], [0, 0, 1, 0], [], []>} : vector<64x8xf32>, vector<128x8xf32>, vector<64x128xf32> -> vector<64x128xf32>
    %c0_3 = arith.constant 0 : index
    %c0_4 = arith.constant 0 : index
    %3 = vector.load %arg3[%c0_3, %c0_4] : memref<64x1xf32, #tpu.memory_space<vmem>>, vector<64x1xf32>
    %4 = vector.broadcast %3 : vector<64x1xf32> to vector<64x128xf32>
    %5 = arith.addf %2, %4 : vector<64x128xf32>
    %cst_5 = arith.constant 0.000000e+00 : f32
    %6 = vector.broadcast %cst_5 : f32 to vector<64x128xf32>
    %7 = arith.maximumf %5, %6 : vector<64x128xf32>
    %c0_6 = arith.constant 0 : index
    %c0_7 = arith.constant 0 : index
    %8 = vector.load %arg4[%c0_6, %c0_7] : memref<64x64xf32, #tpu.memory_space<vmem>>, vector<64x64xf32>
    %cst_8 = arith.constant dense<0.000000e+00> : vector<64x128xf32>
    %9 = tpu.matmul %8, %7, %cst_8 {dimension_numbers = #tpu.dot_dimension_numbers<[1], [0], [0], [1], [0, 0, 1, 1], [], []>} : vector<64x64xf32>, vector<64x128xf32>, vector<64x128xf32> -> vector<64x128xf32>
    %c0_9 = arith.constant 0 : index
    %c0_10 = arith.constant 0 : index
    %10 = vector.load %arg5[%c0_9, %c0_10] : memref<64x1xf32, #tpu.memory_space<vmem>>, vector<64x1xf32>
    %11 = vector.broadcast %10 : vector<64x1xf32> to vector<64x128xf32>
    %12 = arith.addf %9, %11 : vector<64x128xf32>
    %cst_11 = arith.constant 0.000000e+00 : f32
    %13 = vector.broadcast %cst_11 : f32 to vector<64x128xf32>
    %14 = arith.maximumf %12, %13 : vector<64x128xf32>
    %c0_12 = arith.constant 0 : index
    %c0_13 = arith.constant 0 : index
    %15 = vector.load %arg6[%c0_12, %c0_13] : memref<4x64xf32, #tpu.memory_space<vmem>>, vector<4x64xf32>
    %cst_14 = arith.constant dense<0.000000e+00> : vector<4x128xf32>
    %16 = tpu.matmul %15, %14, %cst_14 {dimension_numbers = #tpu.dot_dimension_numbers<[1], [0], [0], [1], [0, 0, 1, 1], [], []>} : vector<4x64xf32>, vector<64x128xf32>, vector<4x128xf32> -> vector<4x128xf32>
    %c0_15 = arith.constant 0 : index
    %c0_16 = arith.constant 0 : index
    %17 = vector.load %arg7[%c0_15, %c0_16] : memref<4x1xf32, #tpu.memory_space<vmem>>, vector<4x1xf32>
    %18 = vector.broadcast %17 : vector<4x1xf32> to vector<4x128xf32>
    %19 = arith.addf %16, %18 : vector<4x128xf32>
    %c0_17 = arith.constant 0 : index
    %c0_18 = arith.constant 0 : index
    %20 = vector.load %arg8[%c0_17, %c0_18] : memref<4x128xf32, #tpu.memory_space<vmem>>, vector<4x128xf32>
    tpu.vector_store %arg8[%c0_17, %c0_18], %19 {strides = array<i32>} : memref<4x128xf32, #tpu.memory_space<vmem>>, vector<4x128xf32>,
    return
  }
  func.func @transform_0(%arg0: i32) -> (i32, i32) {
    %c0_i32 = arith.constant 0 : i32
    %c0_i32_0 = arith.constant 0 : i32
    return %arg0, %c0_i32 : i32, i32
  }
  func.func @transform_1(%arg0: i32) -> (i32, i32) {
    %c0_i32 = arith.constant 0 : i32
    %c0_i32_0 = arith.constant 0 : i32
    %c0_i32_1 = arith.constant 0 : i32
    return %c0_i32, %c0_i32_0 : i32, i32
  }
  func.func @transform_2(%arg0: i32) -> (i32, i32) {
    %c0_i32 = arith.constant 0 : i32
    %c0_i32_0 = arith.constant 0 : i32
    %c0_i32_1 = arith.constant 0 : i32
    return %c0_i32, %c0_i32_0 : i32, i32
  }
  func.func @transform_3(%arg0: i32) -> (i32, i32) {
    %c0_i32 = arith.constant 0 : i32
    %c0_i32_0 = arith.constant 0 : i32
    %c0_i32_1 = arith.constant 0 : i32
    return %c0_i32, %c0_i32_0 : i32, i32
  }
  func.func @transform_4(%arg0: i32) -> (i32, i32) {
    %c0_i32 = arith.constant 0 : i32
    %c0_i32_0 = arith.constant 0 : i32
    %c0_i32_1 = arith.constant 0 : i32
    return %c0_i32, %c0_i32_0 : i32, i32
  }
  func.func @transform_5(%arg0: i32) -> (i32, i32) {
    %c0_i32 = arith.constant 0 : i32
    %c0_i32_0 = arith.constant 0 : i32
    %c0_i32_1 = arith.constant 0 : i32
    return %c0_i32, %c0_i32_0 : i32, i32
  }
  func.func @transform_6(%arg0: i32) -> (i32, i32) {
    %c0_i32 = arith.constant 0 : i32
    %c0_i32_0 = arith.constant 0 : i32
    %c0_i32_1 = arith.constant 0 : i32
    return %c0_i32, %c0_i32_0 : i32, i32
  }
  func.func @transform_7(%arg0: i32) -> (i32, i32) {
    %c0_i32 = arith.constant 0 : i32
    %c0_i32_0 = arith.constant 0 : i32
    return %c0_i32, %arg0 : i32, i32
  }
}

</mosaic_0001>

<bundles_post_ra>
// kernel: diffusion_model_forward.1
= control target key start
LH: loop header
LB: loop body
LE: loop exit
PB: predicated region body
PF: predicated region fallthrough
CT: control target
= control target key end

     0   :  { %vm98_vm0 = vcmask 64512   ;;  %v454_v7 = vmov 0   ;;  %vm276_vm1 = vcmask 523264   ;;  %s713_s0 = inlined_call_operand.vmem [shape: f32[128,8], index: 0, kind: input, shape index: {}]   ;;  %s714_s2 = inlined_call_operand.vmem [shape: f32[64,1], index: 2, kind: input, shape index: {}]   ;;  %s715_s4 = inlined_call_operand.vmem [shape: f32[64,1], index: 4, kind: input, shape index: {}]   ;;  %s716_s6 = inlined_call_operand.vmem [shape: f32[4,1], index: 6, kind: input, shape index: {}]   ;;  %s717_s1 = inlined_call_operand.vmem [shape: f32[64,8], index: 1, kind: input, shape index: {}]   ;;  %s718_s3 = inlined_call_operand.vmem [shape: f32[64,64], index: 3, kind: input, shape index: {}]   ;;  %s719_s5 = inlined_call_operand.vmem [shape: f32[4,64], index: 5, kind: input, shape index: {}]   ;;  %s720_s7 = inlined_call_operand.vmem [shape: f32[4,128], index: 7, kind: output, shape index: {}]  }
   0x1   :  { %v41_v0 = vld [vmem:[%s713_s0 + $0x78] sm:$0xff]  ;;  %v40_v1 = vld [vmem:[%s713_s0 + $0x70] sm:$0xff]  ;;  %v39_v2 = vld [vmem:[%s713_s0 + $0x68] sm:$0xff]  ;;  %451 = vset.pattern.permute.xlu0 %v454_v7  ;;  %452 = vset.pattern.permute.xlu1 %v454_v7 }
   0x2   :  { %419 = vmatpush.xpose.msk.msra.mxu3 %vm98_vm0, %v41_v0  ;;  %418 = vmatpush.xpose.msk.msra.mxu2 %vm98_vm0, %v41_v0  ;;  %v38_v3 = vld [vmem:[%s713_s0 + $0x60] sm:$0xff]  ;;  %v37_v4 = vld [vmem:[%s713_s0 + $0x58] sm:$0xff]  ;;  %v36_v6 = vld [vmem:[%s713_s0 + $0x50] sm:$0xff] }
   0x3   :  { %385 = vmatpush.xpose.msk.msra.mxu0 %vm98_vm0, %v41_v0  ;;  %v57_v5 = vld [vmem:[%s714_s2 + $0x38] sm:$0xff]  ;;  %453 = vset.pattern.permute.xlu2 %v454_v7  ;;  %v55_v8 = vld [vmem:[%s714_s2 + $0x28] sm:$0xff]  ;;  %v56_v10 = vld [vmem:[%s714_s2 + $0x30] sm:$0xff] }
   0x4   :  { %95 = vperm.xlu0 %451, %v57_v5   ;;  %v35_v9 = vld [vmem:[%s713_s0 + $0x48] sm:$0xff]  ;;  %85 = vperm.xlu1 %452, %v55_v8   ;;  %v34_v11 = vld [vmem:[%s713_s0 + $0x40] sm:$0xff]  ;;  %v33_v13 = vld [vmem:[%s713_s0 + $0x38] sm:$0xff] }
   0x5   :  { %v54_v12 = vld [vmem:[%s714_s2 + $0x20] sm:$0xff]  ;;  %v51_v14 = vld [vmem:[%s714_s2 + $0x8] sm:$0xff]  ;;  %v32_v15 = vld [vmem:[%s713_s0 + $0x30] sm:$0xff] }
   0x6   :  { %421 = vmatpush.xpose.msk.msra.mxu3 %vm98_vm0, %v40_v1  ;;  %420 = vmatpush.xpose.msk.msra.mxu2 %vm98_vm0, %v40_v1  ;;  %v50_v16 = vld [vmem:[%s714_s2] sm:$0xff]  ;;  %v31_v17 = vld [vmem:[%s713_s0 + $0x28] sm:$0xff]  ;;  %v234_v18 = vld [vmem:[%s715_s4 + $0x30] sm:$0xff] }
   0x7   :  { %386 = vmatpush.xpose.msk.msra.mxu0 %vm98_vm0, %v40_v1  ;;  %v30_v19 = vld [vmem:[%s713_s0 + $0x20] sm:$0xff]  ;;  %v233_v20 = vld [vmem:[%s715_s4 + $0x28] sm:$0xff]  ;;  %v29_v21 = vld [vmem:[%s713_s0 + $0x18] sm:$0xff] }
   0x8   :  { %v231_v22 = vld [vmem:[%s715_s4 + $0x18] sm:$0xff]  ;;  %v28_v24 = vld [vmem:[%s713_s0 + $0x10] sm:$0xff]  ;;  %v27_v26 = vld [vmem:[%s713_s0 + $0x8] sm:$0xff] }
   0x9   :  { %v53_v23 = vld [vmem:[%s714_s2 + $0x18] sm:$0xff]  ;;  %v230_v25 = vld [vmem:[%s715_s4 + $0x10] sm:$0xff]  ;;  %v228_v28 = vld [vmem:[%s715_s4] sm:$0xff] }
   0xa   :  { %423 = vmatpush.xpose.msk.msra.mxu3 %vm98_vm0, %v39_v2  ;;  %422 = vmatpush.xpose.msk.msra.mxu2 %vm98_vm0, %v39_v2  ;;  %v52_v27 = vld [vmem:[%s714_s2 + $0x10] sm:$0xff]  ;;  %v26_v29 = vld [vmem:[%s713_s0] sm:$0xff]  ;;  %v47_v31 = vld [vmem:[%s717_s1 + $0x28] sm:$0xff] }
   0xb   :  { %387 = vmatpush.xpose.msk.msra.mxu0 %vm98_vm0, %v39_v2  ;;  %75 = vperm.xlu2 %453, %v53_v23   ;;  %v351_v30 = vld [vmem:[%s716_s6] sm:$0xf]  ;;  %v45_v32 = vld [vmem:[%s717_s1 + $0x18] sm:$0xff]  ;;  %v48_v35 = vld [vmem:[%s717_s1 + $0x30] sm:$0xff] }
   0xc   :  { %90 = vperm.xlu0 %451, %v56_v10   ;;  %80 = vperm.xlu1 %452, %v54_v12   ;;  %v42_v33 = vld [vmem:[%s717_s1] sm:$0xff]  ;;  %v235_v34 = vld [vmem:[%s715_s4 + $0x38] sm:$0xff]  ;;  %v43_v37 = vld [vmem:[%s717_s1 + $0x8] sm:$0xff] }
   0xd   :  { %v46_v36 = vld [vmem:[%s717_s1 + $0x20] sm:$0xff]  ;;  %v49_v39 = vld [vmem:[%s717_s1 + $0x38] sm:$0xff]  ;;  %v44_v40 = vld [vmem:[%s717_s1 + $0x10] sm:$0xff] }
   0xe   :  { %425 = vmatpush.xpose.msk.msra.mxu3 %vm98_vm0, %v38_v3  ;;  %424 = vmatpush.xpose.msk.msra.mxu2 %vm98_vm0, %v38_v3  ;;  %v232_v38 = vld [vmem:[%s715_s4 + $0x20] sm:$0xff]  ;;  %v229_v41 = vld [vmem:[%s715_s4 + $0x8] sm:$0xff]  ;;  %v222_v12 = vld [vmem:[%s718_s3 + $0x10] sm:$0xff] }
   0xf   :  { %388 = vmatpush.xpose.msk.msra.mxu0 %vm98_vm0, %v38_v3  ;;  %v220_v10 = vld [vmem:[%s718_s3] sm:$0xff] }
  0x12   :  { %427 = vmatpush.xpose.msk.msra.mxu3 %vm98_vm0, %v37_v4  ;;  %426 = vmatpush.xpose.msk.msra.mxu2 %vm98_vm0, %v37_v4 }
  0x13   :  { %389 = vmatpush.xpose.msk.msra.mxu0 %vm98_vm0, %v37_v4  ;;  %70 = vperm.xlu2 %453, %v52_v27  }
  0x14   :  { %65 = vperm.xlu0 %451, %v51_v14   ;;  %60 = vperm.xlu1 %452, %v50_v16   ;;  %v224_v14 = vld [vmem:[%s718_s3 + $0x20] sm:$0xff]  ;;  %v226_v16 = vld [vmem:[%s718_s3 + $0x30] sm:$0xff] }
  0x16   :  { %429 = vmatpush.xpose.msk.msra.mxu3 %vm98_vm0, %v36_v6  ;;  %428 = vmatpush.xpose.msk.msra.mxu2 %vm98_vm0, %v36_v6 }
  0x17   :  { %390 = vmatpush.xpose.msk.msra.mxu0 %vm98_vm0, %v36_v6 }
  0x1a   :  { %431 = vmatpush.xpose.msk.msra.mxu3 %vm98_vm0, %v35_v9  ;;  %430 = vmatpush.xpose.msk.msra.mxu2 %vm98_vm0, %v35_v9 }
  0x1b   :  { %391 = vmatpush.xpose.msk.msra.mxu0 %vm98_vm0, %v35_v9  ;;  %273 = vperm.xlu2 %453, %v235_v34  }
  0x1c   :  { %268 = vperm.xlu0 %451, %v234_v18   ;;  %263 = vperm.xlu1 %452, %v233_v20  }
  0x1e   :  { %433 = vmatpush.xpose.msk.msra.mxu3 %vm98_vm0, %v34_v11  ;;  %432 = vmatpush.xpose.msk.msra.mxu2 %vm98_vm0, %v34_v11 }
  0x1f   :  { %392 = vmatpush.xpose.msk.msra.mxu0 %vm98_vm0, %v34_v11  ;;  %v221_v11 = vld [vmem:[%s718_s3 + $0x8] sm:$0xff] }
  0x22   :  { %435 = vmatpush.xpose.msk.msra.mxu3 %vm98_vm0, %v33_v13  ;;  %434 = vmatpush.xpose.msk.msra.mxu2 %vm98_vm0, %v33_v13 }
  0x23   :  { %393 = vmatpush.xpose.msk.msra.mxu0 %vm98_vm0, %v33_v13  ;;  %258 = vperm.xlu2 %453, %v232_v38   ;;  %v223_v13 = vld [vmem:[%s718_s3 + $0x18] sm:$0xff] }
  0x24   :  { %253 = vperm.xlu0 %451, %v231_v22   ;;  %248 = vperm.xlu1 %452, %v230_v25  }
  0x26   :  { %437 = vmatpush.xpose.msk.msra.mxu3 %vm98_vm0, %v32_v15  ;;  %436 = vmatpush.xpose.msk.msra.mxu2 %vm98_vm0, %v32_v15 }
  0x27   :  { %394 = vmatpush.xpose.msk.msra.mxu0 %vm98_vm0, %v32_v15  ;;  %v225_v15 = vld [vmem:[%s718_s3 + $0x28] sm:$0xff] }
  0x2a   :  { %439 = vmatpush.xpose.msk.msra.mxu3 %vm98_vm0, %v31_v17  ;;  %438 = vmatpush.xpose.msk.msra.mxu2 %vm98_vm0, %v31_v17 }
  0x2b   :  { %395 = vmatpush.xpose.msk.msra.mxu0 %vm98_vm0, %v31_v17  ;;  %243 = vperm.xlu2 %453, %v229_v41   ;;  %v227_v17 = vld [vmem:[%s718_s3 + $0x38] sm:$0xff] }
  0x2c   :  { %238 = vperm.xlu0 %451, %v228_v28   ;;  %354 = vperm.xlu1 %452, %v351_v30  }
  0x2e   :  { %441 = vmatpush.xpose.msk.msra.mxu3 %vm98_vm0, %v30_v19  ;;  %440 = vmatpush.xpose.msk.msra.mxu2 %vm98_vm0, %v30_v19 }
  0x2f   :  { %396 = vmatpush.xpose.msk.msra.mxu0 %vm98_vm0, %v30_v19 }
  0x32   :  { %443 = vmatpush.xpose.msk.msra.mxu3 %vm98_vm0, %v29_v21  ;;  %442 = vmatpush.xpose.msk.msra.mxu2 %vm98_vm0, %v29_v21 }
  0x33   :  { %397 = vmatpush.xpose.msk.msra.mxu0 %vm98_vm0, %v29_v21 }
  0x36   :  { %445 = vmatpush.xpose.msk.msra.mxu3 %vm98_vm0, %v28_v24  ;;  %444 = vmatpush.xpose.msk.msra.mxu2 %vm98_vm0, %v28_v24 }
  0x37   :  { %398 = vmatpush.xpose.msk.msra.mxu0 %vm98_vm0, %v28_v24 }
  0x3a   :  { %447 = vmatpush.xpose.msk.msra.mxu3 %vm98_vm0, %v27_v26  ;;  %446 = vmatpush.xpose.msk.msra.mxu2 %vm98_vm0, %v27_v26 }
  0x3b   :  { %399 = vmatpush.xpose.msk.msra.mxu0 %vm98_vm0, %v27_v26 }
  0x3e   :  { %449 = vmatpush.xpose.msk.msra.mxu3 %vm98_vm0, %v26_v29  ;;  %448 = vmatpush.xpose.msk.msra.mxu2 %vm98_vm0, %v26_v29 }
  0x3f   :  { %400 = vmatpush.xpose.msk.msra.mxu0 %vm98_vm0, %v26_v29 }
  0x41   :  { %406 = vmatmul.msk.f32.vlgmr.msra.gmra.mxu3 %vm98_vm0, %v47_v31  ;;  %404 = vmatmul.msk.f32.vlgmr.msra.gmra.mxu2 %vm98_vm0, %v45_v32 }
  0x42   :  { %401 = vmatmul.msk.f32.vlgmr.msra.gmra.mxu0 %vm98_vm0, %v42_v33 }
  0x49   :  { %407 = vmatmul.msk.f32.gmra.mxu3 %vm98_vm0, %v48_v35  ;;  %405 = vmatmul.msk.f32.gmra.mxu2 %vm98_vm0, %v46_v36 }
  0x4a   :  { %402 = vmatmul.msk.f32.gmra.mxu0 %vm98_vm0, %v43_v37 }
  0x51   :  { %408 = vmatmul.msk.f32.gmra.mxu3 %vm98_vm0, %v49_v39 }
  0x52   :  { %403 = vmatmul.msk.f32.gmra.mxu0 %vm98_vm0, %v44_v40 }
  0x65   :  { %v76_v49 = vpop.permute.xlu2 %75 }
  0x6d   :  { %v71_v63 = vpop.permute.xlu2 %70 }
  0x75   :  { %v274_v24 = vpop.permute.xlu2 %273 }
  0x76   :  { %v96_v44 = vpop.permute.xlu0 %95  ;;  %v86_v45 = vpop.permute.xlu1 %85 }
  0x7d   :  { %v259_v28 = vpop.permute.xlu2 %258 }
  0x7e   :  { %v91_v50 = vpop.permute.xlu0 %90  ;;  %v81_v54 = vpop.permute.xlu1 %80 }
  0x86   :  { %v66_v2 = vpop.permute.xlu0 %65  ;;  %v61_v5 = vpop.permute.xlu1 %60 }
  0x8e   :  { %v269_v25 = vpop.permute.xlu0 %268  ;;  %v264_v27 = vpop.permute.xlu1 %263 }
  0x96   :  { %v254_v32 = vpop.permute.xlu0 %253  ;;  %v249_v39 = vpop.permute.xlu1 %248 }
  0xbf   :  { %v188_v43 = vpop.f32.mrf.mxu0 }
  0xc0   :  { %v189_v6 = vadd.f32 %v188_v43, %v61_v5 }
  0xc2   :  { %v212_v9 = vmax.f32 %v189_v6, 0.0 }
  0xc4   :  { %v203_v42 = vpop.f32.mrf.mxu3  ;;  %v197_v46 = vpop.f32.mrf.mxu2 }
  0xc5   :  { %v204_v56 = vadd.f32 %v203_v42, %v86_v45  ;;  %v198_v62 = vadd.f32 %v197_v46, %v76_v49  ;;  %v244_v42 = vpop.permute.xlu2 %243  ;;  %v239_v45 = vpop.permute.xlu0 %238 }
  0xc7   :  { %v191_v48 = vpop.f32.mrf.mxu0  ;;  %v217_v61 = vmax.f32 %v204_v56, 0.0  ;;  %v215_v3 = vmax.f32 %v198_v62, 0.0 }
  0xc8   :  { %v192_v4 = vadd.f32 %v191_v48, %v66_v2 }
  0xca   :  { %v213_v8 = vmax.f32 %v192_v4, 0.0 }
  0xcc   :  { %v206_v47 = vpop.f32.mrf.mxu3  ;;  %v200_v55 = vpop.f32.mrf.mxu2 }
  0xcd   :  { %v207_v52 = vadd.f32 %v206_v47, %v91_v50  ;;  %v201_v59 = vadd.f32 %v200_v55, %v81_v54  ;;  %v350_v50 = vld [vmem:[%s719_s5] sm:$0xf] }
  0xcf   :  { %v218_v58 = vmax.f32 %v207_v52, 0.0  ;;  %v194_v60 = vpop.f32.mrf.mxu0  ;;  %v216_v0 = vmax.f32 %v201_v59, 0.0 }
  0xd0   :  { %v195_v1 = vadd.f32 %v194_v60, %v71_v63 }
  0xd2   :  { %v214_v7 = vmax.f32 %v195_v1, 0.0 }
  0xd4   :  { %v209_v51 = vpop.f32.mrf.mxu3 }
  0xd5   :  { %v210_v53 = vadd.f32 %v209_v51, %v96_v44  ;;  %v355_v51 = vpop.permute.xlu1 %354 }
  0xd7   :  { %v219_v57 = vmax.f32 %v210_v53, 0.0 }
  0xd9   :  { %309 = vmatpush.msra.mxu1 %v219_v57 }
  0xdb   :  { %310 = vmatpush.msra.mxu1 %v218_v58 }
  0xdd   :  { %311 = vmatpush.msra.mxu1 %v217_v61 }
  0xdf   :  { %312 = vmatpush.msra.mxu1 %v216_v0 }
  0xe1   :  { %313 = vmatpush.msra.mxu1 %v215_v3 }
  0xe3   :  { %314 = vmatpush.msra.mxu1 %v214_v7 }
  0xe5   :  { %315 = vmatpush.msra.mxu1 %v213_v8 }
  0xe7   :  { %316 = vmatpush.msra.mxu1 %v212_v9 }
  0xe8   :  { %409 = vmatmul.msk.f32.vlgmr.msra.gmra.mxu1 %vm276_vm1, %v220_v10 }
  0xf0   :  { %410 = vmatmul.msk.f32.gmra.mxu1 %vm276_vm1, %v221_v11 }
  0xf8   :  { %411 = vmatmul.msk.f32.gmra.mxu1 %vm276_vm1, %v222_v12 }
 0x100   :  { %412 = vmatmul.msk.f32.gmra.mxu1 %vm276_vm1, %v223_v13 }
 0x108   :  { %413 = vmatmul.msk.f32.gmra.mxu1 %vm276_vm1, %v224_v14 }
 0x110   :  { %414 = vmatmul.msk.f32.gmra.mxu1 %vm276_vm1, %v225_v15 }
 0x118   :  { %415 = vmatmul.msk.f32.gmra.mxu1 %vm276_vm1, %v226_v16 }
 0x120   :  { %416 = vmatmul.msk.f32.gmra.mxu1 %vm276_vm1, %v227_v17 }
 0x165   :  { %v318_v18 = vpop.f32.mrf.mxu1 }
 0x166   :  { %v319_v46 = vadd.f32 %v318_v18, %v239_v45 }
 0x168   :  { %v342_v49 = vmax.f32 %v319_v46, 0.0 }
 0x16d   :  { %v321_v19 = vpop.f32.mrf.mxu1 }
 0x16e   :  { %v322_v43 = vadd.f32 %v321_v19, %v244_v42 }
 0x170   :  { %v343_v48 = vmax.f32 %v322_v43, 0.0 }
 0x175   :  { %v324_v20 = vpop.f32.mrf.mxu1 }
 0x176   :  { %v325_v40 = vadd.f32 %v324_v20, %v249_v39 }
 0x178   :  { %v344_v47 = vmax.f32 %v325_v40, 0.0 }
 0x17d   :  { %v327_v21 = vpop.f32.mrf.mxu1 }
 0x17e   :  { %v328_v37 = vadd.f32 %v327_v21, %v254_v32 }
 0x180   :  { %v345_v44 = vmax.f32 %v328_v37, 0.0 }
 0x185   :  { %v330_v22 = vpop.f32.mrf.mxu1 }
 0x186   :  { %v331_v35 = vadd.f32 %v330_v22, %v259_v28 }
 0x188   :  { %v346_v41 = vmax.f32 %v331_v35, 0.0 }
 0x18d   :  { %v333_v23 = vpop.f32.mrf.mxu1 }
 0x18e   :  { %v334_v33 = vadd.f32 %v333_v23, %v264_v27 }
 0x190   :  { %v347_v38 = vmax.f32 %v334_v33, 0.0 }
 0x195   :  { %v336_v26 = vpop.f32.mrf.mxu1 }
 0x196   :  { %v337_v30 = vadd.f32 %v336_v26, %v269_v25 }
 0x198   :  { %v348_v36 = vmax.f32 %v337_v30, 0.0 }
 0x19d   :  { %v339_v29 = vpop.f32.mrf.mxu1 }
 0x19e   :  { %v340_v31 = vadd.f32 %v339_v29, %v274_v24 }
 0x1a0   :  { %v349_v34 = vmax.f32 %v340_v31, 0.0 }
 0x1a2   :  { %368 = vmatpush.msrb.mxu2 %v349_v34 }
 0x1a4   :  { %369 = vmatpush.msrb.mxu2 %v348_v36 }
 0x1a6   :  { %370 = vmatpush.msrb.mxu2 %v347_v38 }
 0x1a8   :  { %371 = vmatpush.msrb.mxu2 %v346_v41 }
 0x1aa   :  { %372 = vmatpush.msrb.mxu2 %v345_v44 }
 0x1ac   :  { %373 = vmatpush.msrb.mxu2 %v344_v47 }
 0x1ae   :  { %374 = vmatpush.msrb.mxu2 %v343_v48 }
 0x1b0   :  { %375 = vmatpush.msrb.mxu2 %v342_v49 }
 0x1b1   :  { %417 = vmatmul.msk.f32.vlgmr.msrb.gmra.mxu2 %vm276_vm1, %v350_v50 }
 0x234   :  { %v377_v52 = vpop.f32.mrf.mxu2 }
 0x235   :  { %v378_v53 = vadd.f32 %v377_v52, %v355_v51 }
 0x237   :  { %380 = vst [vmem:[%s720_s7] sm:$0xf] %v378_v53 }

</bundles_post_ra>
